<compile_context>
chip_gen: v7x
topology: tpu7x:2x2x1
jax: 0.10.0
libtpu: 0.0.40
codegen_flags: <defaults>
</compile_context>

<pallas_src>
import jax
import jax.numpy as jnp
from jax.experimental import pallas as pl
from jax.experimental.pallas import tpu as pltpu


def _colsum_kernel(hs_ref, w_ref, b_ref, colsum_ref):
    """Pass 1: accumulate packed per-channel column sums of tanh(hs @ W + b)."""
    t = pl.program_id(1)

    @pl.when(t == 0)
    def _init():
        colsum_ref[...] = jnp.zeros_like(colsum_ref)

    C, TNP, _ = hs_ref.shape
    # Channels flattened into the matmul row axis; the block is contiguous and
    # TNP is sublane-aligned, so this reshape is a pure layout view (no copy).
    x = hs_ref[...].reshape(C * TNP, hs_ref.shape[-1])
    h = jnp.dot(x, w_ref[...], preferred_element_type=jnp.float32)
    h = jnp.tanh(h + b_ref[...])                                    # (C*TNP, Dp) f32

    # Unmasked per-channel row sums; zero-padded node rows are corrected
    # exactly in the wrapper (they each contribute tanh(b)).
    parts = [jnp.sum(h[c * TNP:(c + 1) * TNP, :], axis=0, keepdims=True)
             for c in range(C)]                                     # C x (1, Dp)
    colsum_ref[...] += jnp.concatenate(parts, axis=0)[None]         # (1, C, Dp)


def _output_kernel(wts_ref, hs_ref, w_ref, b_ref, out_ref):
    """Pass 2: recompute the tile's new_hs, write the channel-weighted sum."""
    C, TNP, _ = hs_ref.shape
    x = hs_ref[...].reshape(C * TNP, hs_ref.shape[-1])
    h = jnp.dot(x, w_ref[...], preferred_element_type=jnp.float32)
    h = jnp.tanh(h + b_ref[...])                                    # (C*TNP, Dp) f32

    # Unrolled C-term FMA; wts rows are already lane-broadcast.
    acc = wts_ref[0:1, :] * h[0:TNP, :]
    for c in range(1, C):
        acc = acc + wts_ref[c:c + 1, :] * h[c * TNP:(c + 1) * TNP, :]
    out_ref[...] = acc.astype(out_ref.dtype)


def hetero_att_layer(hs, lin_w, lin_b, meta_att, *, tile_n=1024):
    """HeteroAttLayer forward.

    hs:       (C, N, Din)  f32 or bf16 (bf16 halves DMA bytes; math stays f32)
    lin_w:    (Din, Datt)  (transposed torch Linear.weight)
    lin_b:    (Datt,)
    meta_att: (C, Datt)
    returns:  (N, Datt) f32
    """
    C, N, Din = hs.shape
    Datt = lin_w.shape[1]

    # Lane packing: P nodes per 128-lane row when dims allow.
    P = 128 // Din if (Din == Datt and 128 % Din == 0) else 1
    # TODO(synk): Din != Datt (or Din not dividing 128) falls back to the
    # unpacked (lane-masked) layout; a rectangular block-diagonal packing
    # would also cover that case.

    sub = 16 if hs.dtype == jnp.bfloat16 else 8         # sublane packing of hs
    align = sub * P                                      # node-tile alignment

    tile_n = max(align, (int(tile_n) // align) * align)
    # Keep >=2 node tiles when the graph allows it, so pass 2's "parallel"
    # axis (and pass 1's split) can shard across v7x's two TensorCores.
    half_n = -(-((N + 1) // 2) // align) * align
    tile_n = min(tile_n, max(align, half_n))

    n_tiles = -(-N // tile_n)
    n_split = 2 if n_tiles >= 2 else 1                   # pass-1 megacore split
    n_tiles = n_split * (-(-n_tiles // n_split))
    n_pad = n_tiles * tile_n
    tps = n_tiles // n_split                             # tiles per split
    tnp = tile_n // P                                    # packed rows per tile
    Dp_in, Dp_out = P * Din, P * Datt

    mxu_dtype = hs.dtype                                 # bf16 hs => bf16 DMA+MXU
    hs_p = hs if n_pad == N else jnp.pad(hs, ((0, 0), (0, n_pad - N), (0, 0)))
    hs_pk = hs_p.reshape(C, n_pad // P, Dp_in)           # free, contiguous

    lin_w32 = lin_w.astype(jnp.float32)
    lin_b32 = lin_b.astype(jnp.float32)
    w_bd = jnp.kron(jnp.eye(P, dtype=jnp.float32), lin_w32).astype(mxu_dtype)
    b_p = jnp.tile(lin_b32, P).reshape(1, Dp_out)        # bias stays f32

    # ---- Pass 1: packed per-channel column sums ----
    partials = pl.pallas_call(
        _colsum_kernel,
        out_shape=jax.ShapeDtypeStruct((n_split, C, Dp_out), jnp.float32),
        grid=(n_split, tps),
        in_specs=[pl.BlockSpec((C, tnp, Dp_in), lambda p, t: (0, p * tps + t, 0)),
                  pl.BlockSpec((Dp_in, Dp_out), lambda p, t: (0, 0)),
                  pl.BlockSpec((1, Dp_out), lambda p, t: (0, 0))],
        out_specs=pl.BlockSpec((1, C, Dp_out), lambda p, t: (p, 0, 0)),
        compiler_params=pltpu.CompilerParams(
            dimension_semantics=("parallel", "arbitrary")),
    )(hs_pk, w_bd, b_p)

    # Tiny epilogue in plain jnp: fold split halves + lane groups, subtract the
    # exact contribution of zero-padded node rows, channel softmax.
    colsum = partials.sum(axis=0).reshape(C, P, Datt).sum(axis=1)   # (C, Datt)
    colsum = colsum - (n_pad - N) * jnp.tanh(lin_b32)[None, :]
    scores = jnp.sum(colsum * meta_att.astype(jnp.float32), axis=-1) / N
    wts = jax.nn.softmax(scores)                                     # (C,)
    wts_b = jnp.broadcast_to(wts[:, None], (C, Dp_out)).astype(jnp.float32)

    # ---- Pass 2: channel-weighted output, independent node tiles ----
    out_pk = pl.pallas_call(
        _output_kernel,
        out_shape=jax.ShapeDtypeStruct((n_pad // P, Dp_out), jnp.float32),
        grid=(n_tiles,),
        in_specs=[pl.BlockSpec((C, Dp_out), lambda t: (0, 0)),
                  pl.BlockSpec((C, tnp, Dp_in), lambda t: (0, t, 0)),
                  pl.BlockSpec((Dp_in, Dp_out), lambda t: (0, 0)),
                  pl.BlockSpec((1, Dp_out), lambda t: (0, 0))],
        out_specs=pl.BlockSpec((tnp, Dp_out), lambda t: (t, 0)),
        compiler_params=pltpu.CompilerParams(
            dimension_semantics=("parallel",)),
    )(wts_b, hs_pk, w_bd, b_p)

    out = out_pk.reshape(n_pad, Datt)                    # free unpack
    return out[:N]


def hetero_att_ref(hs, lin_w, lin_b, meta_att):
    """Pure-JAX reference mirroring the PyTorch forward."""
    C, N, _ = hs.shape
    new_hs = jnp.tanh(jnp.einsum("cnd,de->cne", hs, lin_w) + lin_b[None, None, :])
    scores = jnp.einsum("cne,ce->c", new_hs, meta_att) / N
    wts = jax.nn.softmax(scores, axis=0)
    return jnp.einsum("c,cne->ne", wts, new_hs)


if __name__ == "__main__":
    # Small shapes consistent with the module; N not divisible by the tile to
    # exercise padding, and multiple tiles to exercise the grid + pass-1 split.
    nchannel, nnode, in_dim, att_dim = 3, 200, 32, 32

    key = jax.random.PRNGKey(0)
    k_hs, k_w, k_b, k_meta = jax.random.split(key, 4)

    hs = jax.random.normal(k_hs, (nchannel, nnode, in_dim), dtype=jnp.float32)

    # Parameter init shapes from __init__ (Linear weight stored pre-transposed).
    lin_limit = (1.0 / in_dim) ** 0.5
    lin_w = jax.random.uniform(k_w, (in_dim, att_dim),
                               minval=-lin_limit, maxval=lin_limit, dtype=jnp.float32)
    lin_b = jax.random.uniform(k_b, (att_dim,),
                               minval=-lin_limit, maxval=lin_limit, dtype=jnp.float32)
    xav = 1.414 * (6.0 / (nchannel + att_dim)) ** 0.5
    meta_att = jax.random.uniform(k_meta, (nchannel, att_dim),
                                  minval=-xav, maxval=xav, dtype=jnp.float32)

    ref = hetero_att_ref(hs, lin_w, lin_b, meta_att)

    # f32 path, default (large, auto-clamped) tile.
    out = jax.block_until_ready(hetero_att_layer(hs, lin_w, lin_b, meta_att))
    assert out.shape == (nnode, att_dim)
    assert jnp.allclose(out, ref, atol=1e-4, rtol=1e-4), "f32 mismatch vs reference"

    # f32 path, small tile: exercises multi-tile accumulation + pass-1 split.
    out_small = jax.block_until_ready(
        hetero_att_layer(hs, lin_w, lin_b, meta_att, tile_n=32))
    assert jnp.allclose(out_small, ref, atol=1e-4, rtol=1e-4), "tiled mismatch vs reference"

    # bf16-input path: producer hands bf16 hs, halving HBM/DMA bytes; the MXU
    # runs bf16 while tanh/softmax/accumulation stay f32.
    out_bf = jax.block_until_ready(
        hetero_att_layer(hs.astype(jnp.bfloat16), lin_w, lin_b, meta_att))
    assert jnp.allclose(out_bf, ref, atol=3e-2, rtol=3e-2), "bf16 mismatch vs reference"

    print("KERNEL_OK")
</pallas_src>

<mosaic_0001>
module attributes {stable_mosaic.version = 11 : i64} {
  func.func @_colsum_kernel(%arg0: i32, %arg1: i32, %arg2: memref<3x32x128xf32, #tpu.memory_space<vmem>>, %arg3: memref<128x128xf32, #tpu.memory_space<vmem>>, %arg4: memref<1x128xf32, #tpu.memory_space<vmem>>, %arg5: memref<1x3x128xf32, #tpu.memory_space<vmem>>) attributes {dimension_semantics = [#tpu.dimension_semantics<parallel>, #tpu.dimension_semantics<arbitrary>], iteration_bounds = array<i64: 2, 1>, scalar_prefetch = 0 : i64, scratch_operands = 0 : i64, tpu.core_type = #tpu.core_type<tc>, window_params = [{transform_indices = @transform_0, window_bounds = array<i64: 3, 32, 128>}, {pipeline_mode = #tpu.pipeline_mode<synchronous>, transform_indices = @transform_1, window_bounds = array<i64: 128, 128>}, {pipeline_mode = #tpu.pipeline_mode<synchronous>, transform_indices = @transform_2, window_bounds = array<i64: 1, 128>}, {transform_indices = @transform_3, window_bounds = array<i64: 1, 3, 128>}]} {
    %c0_i32 = arith.constant 0 : i32
    %0 = arith.cmpi eq, %arg1, %c0_i32 : i32
    %1 = arith.extui %0 : i1 to i32
    %c0_i32_0 = arith.constant 0 : i32
    %2 = arith.cmpi ne, %1, %c0_i32_0 : i32
    scf.if %2 {
      %cst_16 = arith.constant 0.000000e+00 : f32
      %25 = vector.broadcast %cst_16 : f32 to vector<1x3x128xf32>
      %c0_17 = arith.constant 0 : index
      %c0_18 = arith.constant 0 : index
      %c0_19 = arith.constant 0 : index
      %26 = vector.load %arg5[%c0_17, %c0_18, %c0_19] : memref<1x3x128xf32, #tpu.memory_space<vmem>>, vector<1x3x128xf32>
      tpu.vector_store %arg5[%c0_17, %c0_18, %c0_19], %25 {strides = array<i32>} : memref<1x3x128xf32, #tpu.memory_space<vmem>>, vector<1x3x128xf32>,
    } else {
    }
    %c0 = arith.constant 0 : index
    %c0_1 = arith.constant 0 : index
    %c0_2 = arith.constant 0 : index
    %3 = vector.load %arg2[%c0, %c0_1, %c0_2] : memref<3x32x128xf32, #tpu.memory_space<vmem>>, vector<3x32x128xf32>
    %4 = vector.shape_cast %3 : vector<3x32x128xf32> to vector<96x128xf32>
    %c0_3 = arith.constant 0 : index
    %c0_4 = arith.constant 0 : index
    %5 = vector.load %arg3[%c0_3, %c0_4] : memref<128x128xf32, #tpu.memory_space<vmem>>, vector<128x128xf32>
    %cst = arith.constant dense<0.000000e+00> : vector<96x128xf32>
    %6 = tpu.matmul %4, %5, %cst {dimension_numbers = #tpu.dot_dimension_numbers<[1], [0], [0], [1], [0, 0, 1, 1], [], []>} : vector<96x128xf32>, vector<128x128xf32>, vector<96x128xf32> -> vector<96x128xf32>
    %c0_5 = arith.constant 0 : index
    %c0_6 = arith.constant 0 : index
    %7 = vector.load %arg4[%c0_5, %c0_6] : memref<1x128xf32, #tpu.memory_space<vmem>>, vector<1x128xf32>
    %8 = vector.broadcast %7 : vector<1x128xf32> to vector<96x128xf32>
    %9 = arith.addf %6, %8 : vector<96x128xf32>
    %10 = math.tanh %9 : vector<96x128xf32>
    %11 = vector.extract_strided_slice %10 {offsets = [0, 0], sizes = [32, 128], strides = [1, 1]} : vector<96x128xf32> to vector<32x128xf32>
    %cst_7 = arith.constant dense<0.000000e+00> : vector<128xf32>
    %12 = vector.multi_reduction <add>, %11, %cst_7 [0] : vector<32x128xf32> to vector<128xf32>
    %13 = vector.shape_cast %12 : vector<128xf32> to vector<1x128xf32>
    %14 = vector.extract_strided_slice %10 {offsets = [32, 0], sizes = [32, 128], strides = [1, 1]} : vector<96x128xf32> to vector<32x128xf32>
    %cst_8 = arith.constant dense<0.000000e+00> : vector<128xf32>
    %15 = vector.multi_reduction <add>, %14, %cst_8 [0] : vector<32x128xf32> to vector<128xf32>
    %16 = vector.shape_cast %15 : vector<128xf32> to vector<1x128xf32>
    %17 = vector.extract_strided_slice %10 {offsets = [64, 0], sizes = [32, 128], strides = [1, 1]} : vector<96x128xf32> to vector<32x128xf32>
    %cst_9 = arith.constant dense<0.000000e+00> : vector<128xf32>
    %18 = vector.multi_reduction <add>, %17, %cst_9 [0] : vector<32x128xf32> to vector<128xf32>
    %19 = vector.shape_cast %18 : vector<128xf32> to vector<1x128xf32>
    %c0_10 = arith.constant 0 : index
    %c0_11 = arith.constant 0 : index
    %c0_12 = arith.constant 0 : index
    %20 = vector.load %arg5[%c0_10, %c0_11, %c0_12] : memref<1x3x128xf32, #tpu.memory_space<vmem>>, vector<1x3x128xf32>
    %21 = tpu.concatenate %13, %16, %19 in 0 : vector<1x128xf32>, vector<1x128xf32>, vector<1x128xf32> -> vector<3x128xf32>
    %22 = vector.shape_cast %21 : vector<3x128xf32> to vector<1x3x128xf32>
    %23 = arith.addf %20, %22 : vector<1x3x128xf32>
    %c0_13 = arith.constant 0 : index
    %c0_14 = arith.constant 0 : index
    %c0_15 = arith.constant 0 : index
    %24 = vector.load %arg5[%c0_13, %c0_14, %c0_15] : memref<1x3x128xf32, #tpu.memory_space<vmem>>, vector<1x3x128xf32>
    tpu.vector_store %arg5[%c0_13, %c0_14, %c0_15], %23 {strides = array<i32>} : memref<1x3x128xf32, #tpu.memory_space<vmem>>, vector<1x3x128xf32>,
    return
  }
  func.func @transform_0(%arg0: i32, %arg1: i32) -> (i32, i32, i32) {
    %c1_i32 = arith.constant 1 : i32
    %0 = arith.muli %arg0, %c1_i32 : i32
    %1 = arith.addi %0, %arg1 : i32
    %c0_i32 = arith.constant 0 : i32
    %c0_i32_0 = arith.constant 0 : i32
    %c0_i32_1 = arith.constant 0 : i32
    return %c0_i32, %1, %c0_i32_0 : i32, i32, i32
  }
  func.func @transform_1(%arg0: i32, %arg1: i32) -> (i32, i32) {
    %c0_i32 = arith.constant 0 : i32
    %c0_i32_0 = arith.constant 0 : i32
    %c0_i32_1 = arith.constant 0 : i32
    return %c0_i32, %c0_i32_0 : i32, i32
  }
  func.func @transform_2(%arg0: i32, %arg1: i32) -> (i32, i32) {
    %c0_i32 = arith.constant 0 : i32
    %c0_i32_0 = arith.constant 0 : i32
    %c0_i32_1 = arith.constant 0 : i32
    return %c0_i32, %c0_i32_0 : i32, i32
  }
  func.func @transform_3(%arg0: i32, %arg1: i32) -> (i32, i32, i32) {
    %c0_i32 = arith.constant 0 : i32
    %c0_i32_0 = arith.constant 0 : i32
    %c0_i32_1 = arith.constant 0 : i32
    return %arg0, %c0_i32, %c0_i32_0 : i32, i32, i32
  }
}

</mosaic_0001>

<bundles_post_ra>
// kernel: tpu_custom_call.1
= control target key start
LH: loop header
LB: loop body
LE: loop exit
PB: predicated region body
PF: predicated region fallthrough
CT: control target
= control target key end

     0   :  { %8 = vsyncpa [#allocation3], 0  ;;  %s1064_s0 = inlined_call_operand.hbm [shape: f32[3,64,128], index: 0, kind: input, shape index: {}]   ;;  %s1065_s1 = inlined_call_operand.hbm [shape: f32[128,128], index: 1, kind: input, shape index: {}]   ;;  %s1066_s2 = inlined_call_operand.vmem [shape: f32[1,128], index: 2, kind: input, shape index: {}]   ;;  %s1067_s3 = inlined_call_operand.vmem [shape: f32[2,3,128], index: 3, kind: output, shape index: {}]  }
   0x1   :  { %10 = vsyncpa [#allocation3 + $0x1], 0 }
   0x2   :  { %11 = vsyncpa [#allocation5], 0  ;;  %s900_s12 = smov 0   ;;  %s902_s13 = smov 0  }
   0x3   :  { %s904_s14 = smov 0   ;;  %s906_s15 = smov 0  }
   0x4   :  { %s908_s16 = smov 0   ;;  %s910_s17 = smov 0  }
   0x5 LB: > { %s541_s18 = sadd.s32 4294967295, %s868_s17   ;;  %s29_s19 = sadd.s32 1, %s864_s16  ;;  %s868_s17 = sphi %s910_s17, %s17_s17   ;;  %s864_s16 = sphi %s908_s16, %s1086_s16   ;;  %s860_s15 = sphi %s906_s15, %s1085_s15   ;;  %s856_s14 = sphi %s904_s14, %s1084_s14   ;;  %s852_s13 = sphi %s902_s13, %s1083_s13   ;;  %s848_s12 = sphi %s900_s12, %s1082_s12  }
   0x6   : > { %p31_p0 = scmp.ge.s32.totalorder %s29_s19, 2  ;;  %s38_s20 = sadd.s32 1, %s856_s14 }
   0x7   : > { %p45_p1 = scmp.ne.s32.totalorder %s856_s14, %s852_s13  ;;  %p46_p2 = scmp.eq.s32.totalorder %s868_s17, 0 }
   0x8   : > { %s1088_s19 = smov (%p31_p0, %s29_s19), 0  ;;  %p51_p4 = scmp.ne.s32.totalorder %s852_s13, %s848_s12 }
   0x9   : > { %p936_p3 = por %p46_p2, %p45_p1  ;;  %s35_s22 = ssub.s32 %s864_s16, %s1088_s19 }
   0xa   : > { %p943_p5 = scmp.eq.s32.totalorder %s541_s18, 0  ;;  %p36_p6 = scmp.eq.s32.totalorder %s35_s22, 0 }
   0xb   : > { %s1073_s21 = scalar_select %p936_p3, 1, 0 }
   0xc   : > { %s1074_s23 = scalar_select %p943_p5, 1, 0 }
   0xd   : > { %p543_p7 = scmp.ge.s32.totalorder %s868_s17, 1  ;;  %p950_p8 = por %p943_p5, %p51_p4 }
   0xe   : > { %p130_p9 = scmp.lt.s32.totalorder %s868_s17, 3  ;;  %s870_s27 = smov [#allocation4]  }
   0xf   : > { %s1075_s24 = scalar_select %p950_p8, 1, 0 }
  0x10   : > { %s956_s25 = scalar_select %p36_p6, %s856_s14, %s38_s20  }
  0x11   : > { %p958_p10 = pnand %p543_p7, %p130_p9  ;;  %s142_s28 = sshll.u32 %s870_s27, 4  ;;  %s143_s28 = int_to_ptr.vmem [resolvable:$true] %s142_s28 }
  0x12   : > { %s786_s5 = scalar_lea.hbm %s1065_s1, 2048 }
  0x13   : > { %s1076_s26 = scalar_select %p958_p10, 1, 0 }
  0x14   : > { %p698_p11 = pneg %p958_p10  ;;  %p787_p13 = scmp.ne.s32.totalorder %s1065_s1, %s786_s5 }
  0x15   : > { %p793_p4 = scmp.lt.u32.totalorder %s786_s5, %s1065_s1 }
  0x16   : > { %p966_p12 = pnand %p698_p11, %p943_p5 }
  0x18   : > { %p788_p0 = pneg %p966_p12 }
  0x1a   : > { %p789_p1 = pnand %p788_p0, %p787_p13 }
  0x1c   : > { %p790_p2 = pneg %p789_p1 }
  0x1e   : > { %p795_p6 = pnand %p793_p4, %p790_p2 }
  0x20   : > { %798 = shalt.err (!%p795_p6)
}
  0x21   : > { %s799_s10 = scalar_lea.vmem %s143_s28, 2048  ;;  %p807_p5 = scmp.lt.s32.totalorder %s143_s28, %s143_s28 }
  0x22   : > { %p800_p7 = scmp.ne.s32.totalorder %s143_s28, %s799_s10  ;;  %p808_p8 = scmp.lt.s32.totalorder %s799_s10, %s799_s10 }
  0x24   : > { %p802_p9 = pnand %p800_p7, %p788_p0  ;;  %p809_p10 = por %p808_p8, %p807_p5 }
  0x26   : > { %p803_p11 = pneg %p802_p9 }
  0x28   : > { %p810_p3 = pnand %p809_p10, %p803_p11 }
  0x2a   : > { %813 = shalt.err (!%p810_p3)
}
  0x2b   : > { %s871_s11 = smov 128   ;;  %s872_s12 = smov 8  }
  0x2c   : > { %701 = dma.hbm_to_vmem [thread:$0]  (!%p966_p12), %s1065_s1, 2048, %s143_s28, [#allocation5], %s871_s11, %s871_s11, %s872_s12  }
  0x2d   : > { %p545_p13 = scmp.ge.s32.totalorder %s868_s17, 2 }
  0x2f   : > { %155 = sbr.rel (%p545_p13) target bundleno = 70 (0x46), region = 24 }
  0x36   : > { %s159_s22 = sand.u32 1, %s856_s14   ;;  %s556_s30 = sshll.u32 %s864_s16, 9 }
  0x37   : > { %s683_s27 = smul.u32 96, %s159_s22  ;;  %s873_s4 = smov 1024  }
  0x38   : > { %p1078_p3 = scmp.ne.s32.totalorder %s1073_s21, 0  ;;  %s170_s6 = scalar_lea.hbm %s1064_s0, %s556_s30 }
  0x39   : > { %s163_s8 = scalar_lea.vmem [#allocation2], %s683_s27  ;;  %s874_s10 = smov 512  }
  0x3a   : > { %688 = sst [smem:[#allocation7]] (%p1078_p3), %s873_s4  ;;  %s183_s9 = sshll.u32 %s163_s8, 4  ;;  %s184_s9 = int_to_ptr.vmem [resolvable:$true] %s183_s9 }
  0x3b   : > { %s687_s28 = scalar_select %p1078_p3, [#allocation0], [#allocation8] }
  0x3c   : > { %689 = sst [smem:[#allocation7 + $0x1]] (%p1078_p3), %s874_s10  ;;  %s875_s11 = smov 4  }
  0x3d   : > { %s175_s7 = sld [smem:[%s687_s28]]   ;;  %s876_s12 = smov 128  }
  0x3e   : > { %690 = sst [smem:[#allocation7 + $0x2]] (%p1078_p3), %s875_s11  ;;  %s877_s18 = smov 8  }
  0x3f   : > { %691 = sst [smem:[#allocation7 + $0x3]] (%p1078_p3), %s876_s12  ;;  %s160_s27 = scalar_lea.sflag [#allocation3], %s159_s22 }
  0x40   : > { %692 = sst [smem:[#allocation7 + $0x4]] (%p1078_p3), %s876_s12  ;;  %s878_s4 = smov [#allocation6]  }
  0x41   : > { %693 = sst [smem:[#allocation7 + $0x5]] (%p1078_p3), %s877_s18 }
  0x43   : > { %s548_s20 = sshll.u32 %s175_s7, 26 }
  0x44   : > { %s549_s30 = sadd.s32 134217728, %s548_s20 }
  0x45   : > { %694 = dma.general (%p1078_p3), %s170_s6, 1536, %s184_s9, %s160_s27, %s878_s4, [#allocation7], %s549_s30, 0  }
  0x46 PF: > { %p1079_p5 = scmp.ne.s32.totalorder %s1076_s26, 0 }
  0x47   : > { %s210_s28 = sand.u32 (!%p1079_p5), 1, %s852_s13   ;;  %p1080_p8 = scmp.ne.s32.totalorder (!%p1079_p5), %s1075_s24, 0 }
  0x48   : > { %208 = sbr.rel (%p1079_p5) target bundleno = 376 (0x178), region = 32  ;;  %s211_s5 = scalar_lea.sflag (!%p1079_p5), [#allocation3], %s210_s28 }
  0x49   : > { %s684_s29 = smul.u32 (!%p1079_p5), 96, %s210_s28 }
  0x4b   : > { %s1011_s8 = scalar_lea.vmem (!%p1079_p5), [#allocation2], %s684_s29 }
  0x4f   : > { %839 = dma.done.wait (%p1080_p8), %s211_s5, 1536  }
  0x50   : > { %841 = vsyncadd (%p1080_p8), %s211_s5, 4294965760  ;;  %p1081_p10 = scmp.ne.s32.totalorder %s1074_s23, 0 }
  0x52   : > { %843 = dma.done.wait (%p1081_p10), [#allocation5], 2048  }
  0x53   : > { %845 = vsyncadd (%p1081_p10), [#allocation5], 4294965248  ;;  %v263_v0 = vld [vmem:[#allocation4] sm:$0xff]  ;;  %v264_v1 = vld [vmem:[#allocation4 + $0x8] sm:$0xff]  ;;  %p242_p12 = scmp.lt.s32.totalorder %s860_s15, 1  ;;  %v879_v36 = vmov 0.0  }
  0x54   : > { %v265_v2 = vld [vmem:[#allocation4 + $0x10] sm:$0xff]  ;;  %v635_v3 = vpack.c.bf16 %v264_v1, %v263_v0  ;;  %v266_v4 = vld [vmem:[#allocation4 + $0x18] sm:$0xff]  ;;  %v267_v6 = vld [vmem:[#allocation4 + $0x20] sm:$0xff]  ;;  %vm451_vm0 = vcmask 1040384   ;;  %vm453_vm1 = vcmask 1041408  }
  0x55   : > { %v639_v5 = vpack.c.bf16 %v266_v4, %v265_v2  ;;  %v268_v7 = vld [vmem:[#allocation4 + $0x28] sm:$0xff]  ;;  %v251_v9 = vld [vmem:[%s1011_s8] sm:$0xff]  ;;  %v257_v10 = vld [vmem:[%s1011_s8 + $0x30] sm:$0xff]  ;;  %s1090_s15 = smov (!%p242_p12, %s860_s15), 1 }
  0x56   : > { %636 = vmatprep.subr.bf16.mxu0 %v635_v3  ;;  %667 = vmatprep.subr.bf16.mxu1 %v635_v3  ;;  %v643_v8 = vpack.c.bf16 %v268_v7, %v267_v6  ;;  %v269_v11 = vld [vmem:[#allocation4 + $0x30] sm:$0xff]  ;;  %v270_v12 = vld [vmem:[#allocation4 + $0x38] sm:$0xff]  ;;  %v271_v14 = vld [vmem:[#allocation4 + $0x40] sm:$0xff]  ;;  %s552_s21 = sshll.u32 %s1090_s15, 2 }
  0x57   : > { %638 = vmatpush3.bf16.msra.mxu0 %v635_v3  ;;  %675 = vmatpush3.bf16.msra.mxu1 %v635_v3  ;;  %v647_v13 = vpack.c.bf16 %v270_v12, %v269_v11  ;;  %v272_v15 = vld [vmem:[#allocation4 + $0x48] sm:$0xff]  ;;  %v273_v17 = vld [vmem:[#allocation4 + $0x50] sm:$0xff]  ;;  %v274_v18 = vld [vmem:[#allocation4 + $0x58] sm:$0xff]  ;;  %s1038_s26 = scalar_lea.vmem %s1067_s3, %s552_s21 }
  0x58   : > { %640 = vmatprep.subr.bf16.mxu0 %v639_v5  ;;  %668 = vmatprep.subr.bf16.mxu1 %v639_v5  ;;  %v651_v16 = vpack.c.bf16 %v272_v15, %v271_v14  ;;  %v655_v19 = vpack.c.bf16 %v274_v18, %v273_v17  ;;  %v275_v20 = vld [vmem:[#allocation4 + $0x60] sm:$0xff]  ;;  %v276_v21 = vld [vmem:[#allocation4 + $0x68] sm:$0xff]  ;;  %v277_v23 = vld [vmem:[#allocation4 + $0x70] sm:$0xff]  ;;  %250 = vst [vmem:[%s1038_s26] sm:$0x7] %v879_v36 }
  0x59   : > { %617 = vmatprep.mubr.f32.mxu0 %v251_v9  ;;  %626 = vmatprep.mubr.f32.mxu1 %v257_v10  ;;  %v659_v22 = vpack.c.bf16 %v276_v21, %v275_v20  ;;  %v278_v24 = vld [vmem:[#allocation4 + $0x78] sm:$0xff]  ;;  %v252_v26 = vld [vmem:[%s1011_s8 + $0x8] sm:$0xff]  ;;  %v253_v28 = vld [vmem:[%s1011_s8 + $0x10] sm:$0xff] }
  0x5a   : > { %v663_v25 = vpack.c.bf16 %v278_v24, %v277_v23  ;;  %v258_v27 = vld [vmem:[%s1011_s8 + $0x38] sm:$0xff]  ;;  %v259_v29 = vld [vmem:[%s1011_s8 + $0x40] sm:$0xff]  ;;  %v260_v31 = vld [vmem:[%s1011_s8 + $0x48] sm:$0xff] }
  0x5b   : > { %642 = vmatpush3.bf16.msra.mxu0 %v639_v5  ;;  %676 = vmatpush3.bf16.msra.mxu1 %v639_v5  ;;  %v254_v30 = vld [vmem:[%s1011_s8 + $0x18] sm:$0xff]  ;;  %v255_v32 = vld [vmem:[%s1011_s8 + $0x20] sm:$0xff]  ;;  %v261_v33 = vld [vmem:[%s1011_s8 + $0x50] sm:$0xff] }
  0x5c   : > { %644 = vmatprep.subr.bf16.mxu0 %v643_v8  ;;  %669 = vmatprep.subr.bf16.mxu1 %v643_v8  ;;  %v256_v34 = vld [vmem:[%s1011_s8 + $0x28] sm:$0xff]  ;;  %v262_v35 = vld [vmem:[%s1011_s8 + $0x58] sm:$0xff]  ;;  %v553_v37 = vld [vmem:[%s1066_s2] ss:$0 sm:$0xff] }
  0x5f   : > { %646 = vmatpush3.bf16.msra.mxu0 %v643_v8  ;;  %677 = vmatpush3.bf16.msra.mxu1 %v643_v8 }
  0x60   : > { %648 = vmatprep.subr.bf16.mxu0 %v647_v13  ;;  %670 = vmatprep.subr.bf16.mxu1 %v647_v13 }
  0x63   : > { %650 = vmatpush3.bf16.msra.mxu0 %v647_v13  ;;  %678 = vmatpush3.bf16.msra.mxu1 %v647_v13 }
  0x64   : > { %652 = vmatprep.subr.bf16.mxu0 %v651_v16  ;;  %671 = vmatprep.subr.bf16.mxu1 %v651_v16 }
  0x67   : > { %654 = vmatpush3.bf16.msra.mxu0 %v651_v16  ;;  %679 = vmatpush3.bf16.msra.mxu1 %v651_v16 }
  0x68   : > { %656 = vmatprep.subr.bf16.mxu0 %v655_v19  ;;  %672 = vmatprep.subr.bf16.mxu1 %v655_v19 }
  0x6b   : > { %658 = vmatpush3.bf16.msra.mxu0 %v655_v19  ;;  %680 = vmatpush3.bf16.msra.mxu1 %v655_v19 }
  0x6c   : > { %660 = vmatprep.subr.bf16.mxu0 %v659_v22  ;;  %673 = vmatprep.subr.bf16.mxu1 %v659_v22 }
  0x6f   : > { %662 = vmatpush3.bf16.msra.mxu0 %v659_v22  ;;  %681 = vmatpush3.bf16.msra.mxu1 %v659_v22 }
  0x70   : > { %664 = vmatprep.subr.bf16.mxu0 %v663_v25  ;;  %674 = vmatprep.subr.bf16.mxu1 %v663_v25 }
  0x73   : > { %666 = vmatpush3.bf16.msra.mxu0 %v663_v25  ;;  %682 = vmatpush3.bf16.msra.mxu1 %v663_v25 }
  0x76   : > { %618 = vmatmul.mubr.f32.vlgmr.msra.gmra.mrb[0].mxu0 %v252_v26  ;;  %627 = vmatmul.mubr.f32.vlgmr.msra.gmra.mrb[0].mxu1 %v258_v27 }
  0x77   : > { %620 = vmatprep.mubr.f32.mxu0 %v253_v28  ;;  %629 = vmatprep.mubr.f32.mxu1 %v259_v29 }
  0x7a   : > { %621 = vmatmul.mubr.f32.gmra.mrb[2].mxu0 %v254_v30  ;;  %630 = vmatmul.mubr.f32.gmra.mrb[2].mxu1 %v260_v31 }
  0x7b   : > { %623 = vmatprep.mubr.f32.mxu0 %v255_v32  ;;  %632 = vmatprep.mubr.f32.mxu1 %v261_v33 }
  0x7e   : > { %624 = vmatmul.mubr.f32.gmra.mrb[4].mxu0 %v256_v34  ;;  %633 = vmatmul.mubr.f32.gmra.mrb[4].mxu1 %v262_v35 }
 0x149   : > { %v619_v38 = vpop.f32.mrb[0].mxu0  ;;  %v628_v39 = vpop.f32.mrb[0].mxu1 }
 0x14a   : > { %v358_v40 = vadd.f32 %v619_v38, %v553_v37  ;;  %v352_v41 = vpop.f32.mrb[1].mxu0  ;;  %v382_v42 = vpop.f32.mrb[1].mxu1  ;;  %v388_v62 = vadd.f32 %v628_v39, %v553_v37 }
 0x14b   : > { %v353_v43 = vadd.f32 %v553_v37, %v352_v41  ;;  %v383_v60 = vadd.f32 %v553_v37, %v382_v42 }
 0x14c   : > { %762 = vtanh.f32 %v358_v40 }
 0x14d   : > { %764 = vtanh.f32 %v353_v43  ;;  %v622_v44 = vpop.f32.mrb[2].mxu0  ;;  %v631_v45 = vpop.f32.mrb[2].mxu1 }
 0x14e   : > { %v368_v46 = vadd.f32 %v622_v44, %v553_v37  ;;  %v362_v47 = vpop.f32.mrb[3].mxu0  ;;  %v398_v48 = vadd.f32 %v631_v45, %v553_v37  ;;  %v392_v49 = vpop.f32.mrb[3].mxu1 }
 0x14f   : > { %v363_v50 = vadd.f32 %v553_v37, %v362_v47  ;;  %v393_v51 = vadd.f32 %v553_v37, %v392_v49 }
 0x150   : > { %766 = vtanh.f32 %v368_v46 }
 0x151   : > { %768 = vtanh.f32 %v363_v50  ;;  %v625_v52 = vpop.f32.mrb[4].mxu0  ;;  %v634_v53 = vpop.f32.mrb[4].mxu1 }
 0x152   : > { %770 = vtanh.f32 %v398_v48  ;;  %v378_v54 = vadd.f32 %v625_v52, %v553_v37  ;;  %v408_v55 = vadd.f32 %v634_v53, %v553_v37  ;;  %v372_v56 = vpop.f32.mrb[5].mxu0  ;;  %v402_v57 = vpop.f32.mrb[5].mxu1 }
 0x153   : > { %772 = vtanh.f32 %v393_v51  ;;  %v373_v58 = vadd.f32 %v553_v37, %v372_v56  ;;  %v403_v59 = vadd.f32 %v553_v37, %v402_v57  ;;  %v450_v37 = vld [vmem:[%s1038_s26] sm:$0x7] }
 0x154   : > { %774 = vtanh.f32 %v378_v54 }
 0x155   : > { %776 = vtanh.f32 %v408_v55 }
 0x156   : > { %v763_v61 = vpop.eup %762  ;;  %778 = vtanh.f32 %v373_v58 }
 0x157   : > { %v765_v63 = vpop.eup %764  ;;  %780 = vtanh.f32 %v403_v59 }
 0x158   : > { %v423_v0 = vadd.f32 %v765_v63, %v763_v61  ;;  %782 = vtanh.f32 %v383_v60 }
 0x159   : > { %784 = vtanh.f32 %v388_v62 }
 0x15a   : > { %v767_v1 = vpop.eup %766 }
 0x15b   : > { %v769_v2 = vpop.eup %768 }
 0x15c   : > { %v771_v3 = vpop.eup %770  ;;  %v424_v4 = vadd.f32 %v769_v2, %v423_v0 }
 0x15d   : > { %v773_v5 = vpop.eup %772 }
 0x15e   : > { %v775_v6 = vpop.eup %774  ;;  %v425_v7 = vadd.f32 %v767_v1, %v424_v4  ;;  %v441_v8 = vadd.f32 %v773_v5, %v771_v3 }
 0x15f   : > { %v777_v9 = vpop.eup %776 }
 0x160   : > { %v779_v10 = vpop.eup %778  ;;  %v426_v11 = vrot.slane %v425_v7, 4 }
 0x161   : > { %v781_v12 = vpop.eup %780  ;;  %v432_v13 = vadd.f32 %v779_v10, %v775_v6 }
 0x162   : > { %v783_v14 = vpop.eup %782  ;;  %v427_v15 = vadd.f32 %v426_v11, %v425_v7  ;;  %v442_v16 = vadd.f32 %v781_v12, %v441_v8 }
 0x163   : > { %v433_v17 = vadd.f32 %v783_v14, %v432_v13  ;;  %v785_v18 = vpop.eup %784 }
 0x164   : > { %v443_v19 = vadd.f32 %v777_v9, %v442_v16  ;;  %v428_v20 = vrot.slane %v427_v15, 2 }
 0x165   : > { %v434_v21 = vadd.f32 %v785_v18, %v433_v17 }
 0x166   : > { %v444_v22 = vrot.slane %v443_v19, 4  ;;  %v429_v25 = vadd.f32 %v428_v20, %v427_v15 }
 0x167   : > { %v435_v23 = vrot.slane %v434_v21, 4 }
 0x168   : > { %v445_v24 = vadd.f32 %v444_v22, %v443_v19  ;;  %v430_v30 = vrot.slane %v429_v25, 1 }
 0x169   : > { %v436_v26 = vadd.f32 %v435_v23, %v434_v21 }
 0x16a   : > { %v446_v27 = vrot.slane %v445_v24, 2  ;;  %v431_v34 = vadd.f32 %v430_v30, %v429_v25 }
 0x16b   : > { %v437_v28 = vrot.slane %v436_v26, 2 }
 0x16c   : > { %v447_v29 = vadd.f32 %v446_v27, %v445_v24 }
 0x16d   : > { %v438_v31 = vadd.f32 %v437_v28, %v436_v26 }
 0x16e   : > { %v448_v32 = vrot.slane %v447_v29, 1 }
 0x16f   : > { %v439_v33 = vrot.slane %v438_v31, 1 }
 0x170   : > { %v449_v36 = vadd.f32 %v448_v32, %v447_v29 }
 0x171   : > { %v440_v35 = vadd.f32 %v439_v33, %v438_v31 }
 0x173   : > { %v452_v38 = vsel %vm451_vm0, %v431_v34, %v440_v35 }
 0x174   : > { %v454_v39 = vsel %vm453_vm1, %v452_v38, %v449_v36 }
 0x175   : > { %v455_v40 = vadd.f32 %v454_v39, %v450_v37 }
 0x177   : > { %456 = vst [vmem:[%s1038_s26] sm:$0x7] %v455_v40 }
 0x178 PF: > { %s17_s17 = sadd.s32 1, %s868_s17   ;;  %s1082_s12 = smov %s852_s13 }
 0x179   : > { %p14_p0 = scmp.ge.s32.totalorder %s17_s17, 4   ;;  %s1083_s13 = smov %s856_s14 }
 0x17a   : > { %s1084_s14 = smov %s956_s25  ;;  %s1085_s15 = smov %s864_s16 }
 0x17b   : > { %s1086_s16 = smov %s1088_s19  ;;  %16 = sbr.rel (!%p14_p0) target bundleno = 5 (0x5), region = 85 }
 0x182   :  { %476 = vsyncpa [#allocation3], 1 }
 0x183   :  { %478 = vsyncpa [#allocation3 + $0x1], 1 }
 0x184   :  { %479 = vsyncpa [#allocation5], 1 }

</bundles_post_ra>
